<compile_context>
chip_gen: v7x
topology: tpu7x:2x2x1
jax: 0.10.0
libtpu: 0.0.40
codegen_flags: <defaults>
</compile_context>

<pallas_src>
import jax
import jax.numpy as jnp
from jax.experimental import pallas as pl
from jax.experimental.pallas import tpu as pltpu


def _round_up(n, m):
    return ((n + m - 1) // m) * m


def _vmem_budget_bytes():
    """Scoped-VMEM budget per TPU generation (conservative if unknown)."""
    try:
        kind = jax.devices()[0].device_kind.lower()
    except Exception:
        kind = ""
    if "v7" in kind:
        return 48 * 1024 * 1024          # 64 MiB physical on v7x
    if "v5" in kind or "v6" in kind:
        return 96 * 1024 * 1024          # 128 MiB physical on v5e/v6e
    return 48 * 1024 * 1024


def _choose_hw_tile(hwp, c, itemsize, budget):
    """Largest lane-dense tile dividing HWp whose double-buffered in+out (plus an
    f32 staging copy) fits comfortably inside the scoped-VMEM budget."""
    for t in (2048, 1024, 512, 256, 128):
        if hwp % t == 0 and c * t * (4 * itemsize + 4) <= (budget * 3) // 4:
            return t
    return 128  # HWp is always a multiple of 128


# --------------------------------------------------------------------------- #
# Fused path: pool + MLP + recalibration in one kernel (sample fits VMEM).
# --------------------------------------------------------------------------- #
def _make_fused_kernel(inv_hw):
    def kernel(x_ref, w1_ref, b1_ref, w2_ref, b2_ref, o_ref):
        xf = x_ref[0].astype(jnp.float32)                       # (C, HWp)
        mean = jnp.sum(xf, axis=-1, keepdims=True) * inv_hw     # (C, 1)
        h = jnp.dot(w1_ref[...], mean,
                    preferred_element_type=jnp.float32) + b1_ref[...]
        h = h * jax.nn.sigmoid(h)                               # SiLU, (Chid, 1)
        s = jnp.dot(w2_ref[...], h,
                    preferred_element_type=jnp.float32) + b2_ref[...]
        s = jax.nn.sigmoid(s)                                   # (C, 1)
        o_ref[0] = (xf * s).astype(o_ref.dtype)                 # broadcast lanes
    return kernel


# --------------------------------------------------------------------------- #
# Fallback path: streaming pool kernel + XLA-batched MLP + streaming multiply.
# --------------------------------------------------------------------------- #
def _make_pool_kernel(inv_hw, num_tiles, strips):
    def kernel(x_ref, pooled_ref, acc_ref):
        t = pl.program_id(1)

        @pl.when(t == 0)
        def _():
            acc_ref[...] = jnp.zeros_like(acc_ref)

        # Lane-parallel accumulation: plain VPU adds of 128-lane strips; the
        # single cross-lane reduce is deferred to the last tile (keeps the XLU
        # out of the per-tile inner loop).
        for j in range(strips):
            acc_ref[...] += x_ref[0, :, j * 128:(j + 1) * 128].astype(jnp.float32)

        @pl.when(t == num_tiles - 1)
        def _():
            col = jnp.sum(acc_ref[...], axis=-1, keepdims=True) * inv_hw  # (C, 1)
            pooled_ref[...] = col[None]                                   # (1, C, 1)
    return kernel


def _scale_mul_kernel(x_ref, scale_ref, o_ref):
    # x_ref: (1, C, hw_tile), scale_ref: (1, C, 1) f32 -> broadcast over lanes.
    o_ref[...] = (x_ref[...].astype(jnp.float32) * scale_ref[...]).astype(o_ref.dtype)


# --------------------------------------------------------------------------- #
# Wrapper
# --------------------------------------------------------------------------- #
def squeeze_excite(x_nchw, params, *, force_two_pass=False, max_hw_tile=None):
    """SE forward. x_nchw: (N, C, H, W). Returns (N, C, H, W)."""
    w1, b1, w2, b2 = params              # PyTorch nn.Linear layout: (out, in)
    N, C, H, W = x_nchw.shape
    HW = H * W
    Chid = w1.shape[0]
    itemsize = jnp.dtype(x_nchw.dtype).itemsize

    # Zero-pad spatial up to a multiple of 128 lanes (mean uses true 1/HW, so
    # pads are exact; padded outputs are zero and sliced away below).
    HWp = _round_up(HW, 128)
    x = x_nchw.reshape(N, C, HW)
    if HWp != HW:
        x = jnp.pad(x, ((0, 0), (0, 0), (0, HWp - HW)))

    budget = _vmem_budget_bytes()
    inv_hw = 1.0 / HW

    w_bytes = sum(int(a.size) * jnp.dtype(a.dtype).itemsize
                  for a in (w1, b1, w2, b2))
    # in + out sample blocks double-buffered + two f32 temporaries + weights.
    fused_need = C * HWp * (4 * itemsize + 8) + 2 * w_bytes + (1 << 20)

    if (not force_two_pass) and fused_need <= budget:
        # ---- Fused: one pass over x per sample, grid sharded across cores. --
        # TODO(synk): for N == 1 on v7x one TensorCore idles; a size-2 split of
        # the spatial reduction would recover it (not needed for typical N).
        y = pl.pallas_call(
            _make_fused_kernel(inv_hw),
            out_shape=jax.ShapeDtypeStruct((N, C, HWp), x.dtype),
            grid_spec=pltpu.PrefetchScalarGridSpec(
                num_scalar_prefetch=0,
                grid=(N,),
                in_specs=[
                    pl.BlockSpec((1, C, HWp), lambda n: (n, 0, 0)),
                    pl.BlockSpec((Chid, C), lambda n: (0, 0)),
                    pl.BlockSpec((Chid, 1), lambda n: (0, 0)),
                    pl.BlockSpec((C, Chid), lambda n: (0, 0)),
                    pl.BlockSpec((C, 1), lambda n: (0, 0)),
                ],
                out_specs=pl.BlockSpec((1, C, HWp), lambda n: (n, 0, 0)),
            ),
            compiler_params=pltpu.CompilerParams(
                dimension_semantics=("parallel",),
                vmem_limit_bytes=budget),
        )(x, w1, b1.reshape(Chid, 1), w2, b2.reshape(C, 1))
    else:
        # ---- Two-pass fallback for samples too large for VMEM. -------------
        hw_tile = _choose_hw_tile(HWp, C, itemsize, budget)
        if max_hw_tile is not None:
            hw_tile = max(128, min(hw_tile, max_hw_tile))
        num_tiles = HWp // hw_tile
        strips = hw_tile // 128

        # Pass 1: global average pool -> (N, C, 1) f32 means.
        pooled = pl.pallas_call(
            _make_pool_kernel(inv_hw, num_tiles, strips),
            out_shape=jax.ShapeDtypeStruct((N, C, 1), jnp.float32),
            grid_spec=pltpu.PrefetchScalarGridSpec(
                num_scalar_prefetch=0,
                grid=(N, num_tiles),
                in_specs=[pl.BlockSpec((1, C, hw_tile), lambda n, t: (n, 0, t))],
                out_specs=pl.BlockSpec((1, C, 1), lambda n, t: (n, 0, 0)),
                scratch_shapes=[pltpu.VMEM((C, 128), jnp.float32)],
            ),
            compiler_params=pltpu.CompilerParams(
                dimension_semantics=("parallel", "arbitrary"),
                vmem_limit_bytes=budget),
        )(x)

        # Tiny squeeze MLP, batched over samples in plain XLA (keeps the
        # weights out of the streaming kernels; scale stays f32).
        ym = pooled[:, :, 0].astype(jnp.float32)                     # (N, C)
        h = ym @ w1.T.astype(jnp.float32) + b1.astype(jnp.float32)
        h = h * jax.nn.sigmoid(h)                                    # SiLU
        s = jax.nn.sigmoid(h @ w2.T.astype(jnp.float32) + b2.astype(jnp.float32))
        scale = s[:, :, None]                                        # (N, C, 1) f32

        # Pass 2: channel recalibration y = x * scale (fully parallel grid).
        y = pl.pallas_call(
            _scale_mul_kernel,
            out_shape=jax.ShapeDtypeStruct((N, C, HWp), x.dtype),
            grid_spec=pltpu.PrefetchScalarGridSpec(
                num_scalar_prefetch=0,
                grid=(N, num_tiles),
                in_specs=[
                    pl.BlockSpec((1, C, hw_tile), lambda n, t: (n, 0, t)),
                    pl.BlockSpec((1, C, 1), lambda n, t: (n, 0, 0)),
                ],
                out_specs=pl.BlockSpec((1, C, hw_tile), lambda n, t: (n, 0, t)),
            ),
            compiler_params=pltpu.CompilerParams(
                dimension_semantics=("parallel", "parallel"),
                vmem_limit_bytes=budget),
        )(x, scale)

    if HWp != HW:
        y = y[:, :, :HW]
    return y.reshape(N, C, H, W)


def init_params(key, in_channels, reduction):
    """Weights in PyTorch nn.Linear layout: weight (out_features, in_features)."""
    hidden = max(in_channels // reduction, 1)
    k1, k2, k3, k4 = jax.random.split(key, 4)
    s1 = 1.0 / in_channels ** 0.5
    s2 = 1.0 / hidden ** 0.5
    w1 = jax.random.normal(k1, (hidden, in_channels), jnp.float32) * s1
    b1 = jax.random.normal(k2, (hidden,), jnp.float32) * s1
    w2 = jax.random.normal(k3, (in_channels, hidden), jnp.float32) * s2
    b2 = jax.random.normal(k4, (in_channels,), jnp.float32) * s2
    return w1, b1, w2, b2


def _reference_se(x, params):
    """Pure-JAX reference for a correctness check."""
    w1, b1, w2, b2 = params
    N, C, H, W = x.shape
    y = x.reshape(N, C, H * W).mean(axis=2)          # (N, C)
    h = y @ w1.T + b1
    h = h * jax.nn.sigmoid(h)                        # SiLU
    s = jax.nn.sigmoid(h @ w2.T + b2)                # (N, C)
    return x * s[:, :, None, None]


if __name__ == "__main__":
    key = jax.random.PRNGKey(0)

    cases = [
        # (N, C, H, W, reduction, kwargs)
        (2, 64, 16, 16, 16, {}),                                   # fused path
        (2, 32, 7, 7, 8, {}),                                      # fused + padding
        (2, 64, 16, 16, 16, dict(force_two_pass=True,              # fallback path,
                                 max_hw_tile=128)),                # multi-tile pool
    ]

    for idx, (N, C, H, W, red, kwargs) in enumerate(cases):
        kx, kp, key = jax.random.split(key, 3)
        x = jax.random.normal(kx, (N, C, H, W), jnp.float32)
        params = init_params(kp, C, red)

        out = squeeze_excite(x, params, **kwargs)
        out = jax.block_until_ready(out)

        ref = _reference_se(x, params)
        assert out.shape == (N, C, H, W)
        err = float(jnp.max(jnp.abs(out - ref)))
        assert jnp.allclose(out, ref, atol=1e-4, rtol=1e-4), (idx, err)

    print("KERNEL_OK")
</pallas_src>

<mosaic_0001>
module attributes {stable_mosaic.version = 11 : i64} {
  func.func @kernel(%arg0: i32, %arg1: memref<1x64x256xf32, #tpu.memory_space<vmem>>, %arg2: memref<4x64xf32, #tpu.memory_space<vmem>>, %arg3: memref<4x1xf32, #tpu.memory_space<vmem>>, %arg4: memref<64x4xf32, #tpu.memory_space<vmem>>, %arg5: memref<64x1xf32, #tpu.memory_space<vmem>>, %arg6: memref<1x64x256xf32, #tpu.memory_space<vmem>>) attributes {dimension_semantics = [#tpu.dimension_semantics<parallel>], iteration_bounds = array<i64: 2>, scalar_prefetch = 0 : i64, scratch_operands = 0 : i64, tpu.core_type = #tpu.core_type<tc>, window_params = [{transform_indices = @transform_0, window_bounds = array<i64: 1, 64, 256>}, {pipeline_mode = #tpu.pipeline_mode<synchronous>, transform_indices = @transform_1, window_bounds = array<i64: 4, 64>}, {pipeline_mode = #tpu.pipeline_mode<synchronous>, transform_indices = @transform_2, window_bounds = array<i64: 4, 1>}, {pipeline_mode = #tpu.pipeline_mode<synchronous>, transform_indices = @transform_3, window_bounds = array<i64: 64, 4>}, {pipeline_mode = #tpu.pipeline_mode<synchronous>, transform_indices = @transform_4, window_bounds = array<i64: 64, 1>}, {transform_indices = @transform_5, window_bounds = array<i64: 1, 64, 256>}]} {
    %c0 = arith.constant 0 : index
    %c0_0 = arith.constant 0 : index
    %c0_1 = arith.constant 0 : index
    %0 = vector.load %arg1[%c0, %c0_0, %c0_1] : memref<1x64x256xf32, #tpu.memory_space<vmem>>, vector<1x64x256xf32>
    %1 = vector.shape_cast %0 : vector<1x64x256xf32> to vector<64x256xf32>
    %cst = arith.constant dense<0.000000e+00> : vector<64xf32>
    %2 = vector.multi_reduction <add>, %1, %cst [1] : vector<64x256xf32> to vector<64xf32>
    %3 = vector.shape_cast %2 : vector<64xf32> to vector<64x1xf32>
    %cst_2 = arith.constant 3.906250e-03 : f32
    %4 = vector.broadcast %cst_2 : f32 to vector<64x1xf32>
    %5 = arith.mulf %3, %4 : vector<64x1xf32>
    %c0_3 = arith.constant 0 : index
    %c0_4 = arith.constant 0 : index
    %6 = vector.load %arg2[%c0_3, %c0_4] : memref<4x64xf32, #tpu.memory_space<vmem>>, vector<4x64xf32>
    %cst_5 = arith.constant dense<0.000000e+00> : vector<4x1xf32>
    %7 = tpu.matmul %6, %5, %cst_5 {dimension_numbers = #tpu.dot_dimension_numbers<[1], [0], [0], [1], [0, 0, 1, 1], [], []>} : vector<4x64xf32>, vector<64x1xf32>, vector<4x1xf32> -> vector<4x1xf32>
    %c0_6 = arith.constant 0 : index
    %c0_7 = arith.constant 0 : index
    %8 = vector.load %arg3[%c0_6, %c0_7] : memref<4x1xf32, #tpu.memory_space<vmem>>, vector<4x1xf32>
    %9 = arith.addf %7, %8 : vector<4x1xf32>
    %10 = arith.negf %9 : vector<4x1xf32>
    %11 = math.exp %10 : vector<4x1xf32>
    %cst_8 = arith.constant 1.000000e+00 : f32
    %12 = vector.broadcast %cst_8 : f32 to vector<4x1xf32>
    %13 = arith.addf %12, %11 : vector<4x1xf32>
    %14 = arith.divf %12, %13 : vector<4x1xf32>
    %15 = arith.mulf %9, %14 : vector<4x1xf32>
    %c0_9 = arith.constant 0 : index
    %c0_10 = arith.constant 0 : index
    %16 = vector.load %arg4[%c0_9, %c0_10] : memref<64x4xf32, #tpu.memory_space<vmem>>, vector<64x4xf32>
    %cst_11 = arith.constant dense<0.000000e+00> : vector<64x1xf32>
    %17 = tpu.matmul %16, %15, %cst_11 {dimension_numbers = #tpu.dot_dimension_numbers<[1], [0], [0], [1], [0, 0, 1, 1], [], []>} : vector<64x4xf32>, vector<4x1xf32>, vector<64x1xf32> -> vector<64x1xf32>
    %c0_12 = arith.constant 0 : index
    %c0_13 = arith.constant 0 : index
    %18 = vector.load %arg5[%c0_12, %c0_13] : memref<64x1xf32, #tpu.memory_space<vmem>>, vector<64x1xf32>
    %19 = arith.addf %17, %18 : vector<64x1xf32>
    %20 = arith.negf %19 : vector<64x1xf32>
    %21 = math.exp %20 : vector<64x1xf32>
    %cst_14 = arith.constant 1.000000e+00 : f32
    %22 = vector.broadcast %cst_14 : f32 to vector<64x1xf32>
    %23 = arith.addf %22, %21 : vector<64x1xf32>
    %24 = arith.divf %22, %23 : vector<64x1xf32>
    %25 = vector.broadcast %24 : vector<64x1xf32> to vector<64x256xf32>
    %26 = arith.mulf %1, %25 : vector<64x256xf32>
    %c0_15 = arith.constant 0 : index
    %c0_16 = arith.constant 0 : index
    %c0_17 = arith.constant 0 : index
    %27 = vector.load %arg6[%c0_15, %c0_16, %c0_17] : memref<1x64x256xf32, #tpu.memory_space<vmem>>, vector<1x64x256xf32>
    %28 = vector.shape_cast %27 : vector<1x64x256xf32> to vector<64x256xf32>
    %29 = vector.shape_cast %26 : vector<64x256xf32> to vector<1x64x256xf32>
    tpu.vector_store %arg6[%c0_15, %c0_16, %c0_17], %29 {strides = array<i32>} : memref<1x64x256xf32, #tpu.memory_space<vmem>>, vector<1x64x256xf32>,
    return
  }
  func.func @transform_0(%arg0: i32) -> (i32, i32, i32) {
    %c0_i32 = arith.constant 0 : i32
    %c0_i32_0 = arith.constant 0 : i32
    %c0_i32_1 = arith.constant 0 : i32
    return %arg0, %c0_i32, %c0_i32_0 : i32, i32, i32
  }
  func.func @transform_1(%arg0: i32) -> (i32, i32) {
    %c0_i32 = arith.constant 0 : i32
    %c0_i32_0 = arith.constant 0 : i32
    %c0_i32_1 = arith.constant 0 : i32
    return %c0_i32, %c0_i32_0 : i32, i32
  }
  func.func @transform_2(%arg0: i32) -> (i32, i32) {
    %c0_i32 = arith.constant 0 : i32
    %c0_i32_0 = arith.constant 0 : i32
    %c0_i32_1 = arith.constant 0 : i32
    return %c0_i32, %c0_i32_0 : i32, i32
  }
  func.func @transform_3(%arg0: i32) -> (i32, i32) {
    %c0_i32 = arith.constant 0 : i32
    %c0_i32_0 = arith.constant 0 : i32
    %c0_i32_1 = arith.constant 0 : i32
    return %c0_i32, %c0_i32_0 : i32, i32
  }
  func.func @transform_4(%arg0: i32) -> (i32, i32) {
    %c0_i32 = arith.constant 0 : i32
    %c0_i32_0 = arith.constant 0 : i32
    %c0_i32_1 = arith.constant 0 : i32
    return %c0_i32, %c0_i32_0 : i32, i32
  }
  func.func @transform_5(%arg0: i32) -> (i32, i32, i32) {
    %c0_i32 = arith.constant 0 : i32
    %c0_i32_0 = arith.constant 0 : i32
    %c0_i32_1 = arith.constant 0 : i32
    return %arg0, %c0_i32, %c0_i32_0 : i32, i32, i32
  }
}

</mosaic_0001>

<bundles_post_ra>
// kernel: tpu_custom_call.1
= control target key start
LH: loop header
LB: loop body
LE: loop exit
PB: predicated region body
PF: predicated region fallthrough
CT: control target
= control target key end

     0   :  { %10 = vsyncpa [#allocation3], 0  ;;  %s1370_s0 = inlined_call_operand.hbm [shape: f32[2,64,256], index: 0, kind: input, shape index: {}]   ;;  %s1371_s1 = inlined_call_operand.vmem [shape: f32[4,64], index: 1, kind: input, shape index: {}]   ;;  %s1372_s2 = inlined_call_operand.vmem [shape: f32[4,1], index: 2, kind: input, shape index: {}]   ;;  %s1373_s3 = inlined_call_operand.vmem [shape: f32[64,4], index: 3, kind: input, shape index: {}]   ;;  %s1374_s4 = inlined_call_operand.vmem [shape: f32[64,1], index: 4, kind: input, shape index: {}]   ;;  %s1375_s5 = inlined_call_operand.hbm [shape: f32[2,64,256], index: 5, kind: output, shape index: {}]  }
   0x1   :  { %12 = vsyncpa [#allocation3 + $0x1], 0 }
   0x2   :  { %13 = vsyncpa [#allocation4], 0 }
   0x3   :  { %15 = vsyncpa [#allocation4 + $0x1], 0  ;;  %s1059_s18 = smov 0   ;;  %s1061_s19 = smov 0  }
   0x4   :  { %s1063_s20 = smov 0   ;;  %s1065_s21 = smov 0  }
   0x5 LB: > { %s1080_s22 = sadd.s32 4294967295, %s1017_s21   ;;  %s731_s23 = sadd.s32 4294967294, %s1017_s21   ;;  %s1017_s21 = sphi %s1065_s21, %s1388_s21   ;;  %s1013_s20 = sphi %s1063_s20, %s1387_s20   ;;  %s1009_s19 = sphi %s1061_s19, %s1386_s19   ;;  %s1005_s18 = sphi %s1059_s18, %s1385_s18  }
   0x6   : > { %s1084_s24 = sadd.s32 1, %s1017_s21   ;;  %s28_s25 = sadd.s32 1, %s1013_s20 }
   0x7   : > { %s25_s26 = ssub.s32 %s1017_s21, %s1084_s24  ;;  %p35_p0 = scmp.ne.s32.totalorder %s1013_s20, %s1009_s19 }
   0x8   : > { %p26_p1 = scmp.eq.s32.totalorder %s25_s26, 0  ;;  %p36_p2 = scmp.eq.s32.totalorder %s1017_s21, 0 }
   0x9   : > { %p41_p3 = scmp.ne.s32.totalorder %s1009_s19, %s1005_s18  ;;  %p42_p4 = scmp.eq.s32.totalorder %s1080_s22, 0 }
   0xa   : > { %s1096_s27 = scalar_select %p26_p1, %s1013_s20, %s28_s25  }
   0xb   : > { %p1098_p5 = por %p36_p2, %p35_p0  ;;  %p1102_p6 = por %p42_p4, %p41_p3 }
   0xc   : > { %p149_p7 = scmp.eq.s32.totalorder %s1080_s22, 1  ;;  %p155_p8 = scmp.eq.s32.totalorder %s731_s23, 1 }
   0xd   : > { %p841_p10 = scmp.lt.s32.totalorder %s1017_s21, 2  ;;  %s187_s7 = sand.u32 1, %s1013_s20  }
   0xe   : > { %p1109_p11 = por %p149_p7, %p35_p0  ;;  %p1113_p12 = por %p155_p8, %p41_p3 }
   0xf   : > { %s764_s8 = sshll.u32 %s1017_s21, 11  ;;  %s734_s9 = sshll.u32 %s187_s7, 7 }
  0x10   : > { %s1379_s30 = scalar_select %p1109_p11, 1, 0 }
  0x11   : > { %s1380_s6 = scalar_select %p1113_p12, 1, 0 }
  0x12   : > { %s1122_s12 = scalar_lea.hbm %s1370_s0, %s764_s8  ;;  %s191_s13 = scalar_lea.vmem [#allocation2], %s734_s9 }
  0x13   : > { %s198_s14 = sshll.u32 %s191_s13, 4  ;;  %p1126_p13 = pnand %p841_p10, %p1098_p5  ;;  %s1130_s14 = int_to_ptr.vmem [resolvable:$true] %s198_s14 }
  0x14   : > { %s1132_s16 = scalar_lea.sflag [#allocation3], %s187_s7  ;;  %s921_s17 = scalar_lea.hbm %s1122_s12, 2048 }
  0x15   : > { %p922_p0 = scmp.ne.s32.totalorder %s1122_s12, %s921_s17  ;;  %p923_p1 = pneg %p1126_p13 }
  0x16   : > { %s926_s26 = scalar_lea.hbm %s1370_s0, 4096  ;;  %p927_p4 = scmp.lt.u32.totalorder %s1122_s12, %s1370_s0 }
  0x17   : > { %p924_p2 = pnand %p923_p1, %p922_p0  ;;  %p928_p5 = scmp.lt.u32.totalorder %s926_s26, %s921_s17 }
  0x18   : > { %p930_p8 = scmp.lt.u32.totalorder %s921_s17, %s1122_s12 }
  0x19   : > { %p925_p3 = pneg %p924_p2  ;;  %p929_p7 = por %p928_p5, %p927_p4 }
  0x1b   : > { %p931_p10 = por %p930_p8, %p929_p7 }
  0x1d   : > { %p932_p9 = pnand %p931_p10, %p925_p3 }
  0x1f   : > { %935 = shalt.err (!%p932_p9)
}
  0x20   : > { %s936_s7 = scalar_lea.vmem %s1130_s14, 2048  ;;  %s1019_s9 = smov [#allocation2]  }
  0x21   : > { %p937_p0 = scmp.ne.s32.totalorder %s1130_s14, %s936_s7  ;;  %s941_s10 = sshll.u32 %s1019_s9, 4  ;;  %s942_s10 = int_to_ptr.vmem [resolvable:$false] %s941_s10 }
  0x22   : > { %s943_s11 = scalar_lea.vmem %s942_s10, 4096  ;;  %p944_p11 = scmp.lt.s32.totalorder %s1130_s14, %s942_s10 }
  0x23   : > { %p939_p2 = pnand %p937_p0, %p923_p1  ;;  %p945_p4 = scmp.lt.s32.totalorder %s943_s11, %s936_s7 }
  0x25   : > { %p940_p12 = pneg %p939_p2  ;;  %p946_p5 = por %p945_p4, %p944_p11 }
  0x27   : > { %p947_p7 = pnand %p946_p5, %p940_p12 }
  0x29   : > { %950 = shalt.err (!%p947_p7)
}
  0x2a   : > { %s1020_s13 = smov 256   ;;  %s1021_s17 = smov 16  }
  0x2b   : > { %836 = dma.hbm_to_vmem [thread:$0]  (!%p1126_p13), %s1122_s12, 2048, %s1130_s14, %s1132_s16, %s1020_s13, %s1020_s13, %s1021_s17  }
  0x2c   : > { %p737_p9 = scmp.ge.s32.totalorder %s1017_s21, 1  ;;  %p206_p1 = scmp.lt.s32.totalorder %s1017_s21, 3 }
  0x2e   : > { %p207_p3 = pnand %p737_p9, %p206_p1 }
  0x2f   : > { %s1163_s23 = sand.u32 (!%p207_p3), 1, %s1009_s19  }
  0x30   : > { %210 = sbr.rel (%p207_p3) target bundleno = 878 (0x36e), region = 40  ;;  %s738_s25 = sshll.u32 (!%p207_p3), %s1163_s23, 7 }
  0x31   : > { %s213_s26 = scalar_lea.sflag (!%p207_p3), [#allocation3], %s1163_s23  ;;  %s216_s28 = scalar_lea.vmem (!%p207_p3), [#allocation2], %s738_s25 }
  0x37   : > { %996 = dma.done.wait (%p1102_p6), %s213_s26, 2048  }
  0x38   : > { %998 = vsyncadd (%p1102_p6), %s213_s26, 4294965248  ;;  %v1173_v0 = vld [vmem:[%s216_s28 + $0x20] sm:$0xff]  ;;  %v1175_v1 = vld [vmem:[%s216_s28 + $0x28] sm:$0xff]  ;;  %v1022_v24 = vmov 0.0|0.0   ;;  %vm1023_vm0 = vmmov 0   ;;  %v1024_v25 = vmov 0.0  }
  0x39   : > { %v1177_v2 = vld [vmem:[%s216_s28] sm:$0xff]  ;;  %v265_v3 = vadd.f32 %v1175_v1, %v1173_v0  ;;  %v1181_v4 = vld [vmem:[%s216_s28 + $0x8] sm:$0xff]  ;;  %v1183_v5 = vld [vmem:[%s216_s28 + $0x30] sm:$0xff]  ;;  %817 = vmatprep.subr.bf16.mxu0 %v1022_v24  ;;  %800 = vmatprep.mubr.msk.f32.mxu0 %vm1023_vm0, %v1024_v25  ;;  %vm293_vm1 = vcmask 523264   ;;  %vm390_vm2 = vcmask 31744   ;;  %vm415_vm3 = vcmask 1043456  }
  0x3a   : > { %v1185_v6 = vld [vmem:[%s216_s28 + $0x38] sm:$0xff]  ;;  %v259_v7 = vadd.f32 %v1181_v4, %v1177_v2  ;;  %v1189_v8 = vld [vmem:[%s216_s28 + $0x10] sm:$0xff]  ;;  %v1201_v14 = vld [vmem:[%s216_s28 + $0x40] sm:$0xff]  ;;  %s1289_s10 = scalar_lea.vmem [#allocation5], %s738_s25  ;;  %s765_s25 = sshll.u32 %s1080_s22, 11 }
  0x3b   : > { %v1191_v9 = vld [vmem:[%s216_s28 + $0x18] sm:$0xff]  ;;  %266 = vadd.xlane.f32.xlu1 %v265_v3  ;;  %v268_v10 = vadd.f32 %v1185_v6, %v1183_v5  ;;  %v1197_v12 = vld [vmem:[%s216_s28 + $0x50] sm:$0xff]  ;;  %v1203_v15 = vld [vmem:[%s216_s28 + $0x48] sm:$0xff]  ;;  %v1025_v3 = vmov 0   ;;  %s658_s11 = sshll.u32 %s1289_s10, 4  ;;  %s1320_s26 = scalar_lea.hbm %s1375_s5, %s765_s25  ;;  %s1322_s11 = int_to_ptr.vmem [resolvable:$true] %s658_s11 }
  0x3c   : > { %260 = vadd.xlane.f32.xlu0 %v259_v7  ;;  %v262_v11 = vadd.f32 %v1191_v9, %v1189_v8  ;;  %v1199_v13 = vld [vmem:[%s216_s28 + $0x58] sm:$0xff]  ;;  %v271_v17 = vadd.f32 %v1203_v15, %v1201_v14  ;;  %v1209_v18 = vld [vmem:[%s216_s28 + $0x70] sm:$0xff]  ;;  %v1213_v20 = vld [vmem:[%s216_s28 + $0x60] sm:$0xff]  ;;  %884 = vset.pattern.permute.xlu1 %v1025_v3  ;;  %s645_s22 = scalar_lea.sflag [#allocation4], %s1163_s23  ;;  %p1382_p11 = scmp.ne.s32.totalorder %s1379_s30, 0 }
  0x3d   : > { %v274_v16 = vadd.f32 %v1199_v13, %v1197_v12  ;;  %v1211_v19 = vld [vmem:[%s216_s28 + $0x78] sm:$0xff]  ;;  %v1215_v21 = vld [vmem:[%s216_s28 + $0x68] sm:$0xff]  ;;  %v291_v46 = vld [vmem:[%s1371_s1] sm:$0xf]  ;;  %883 = vset.pattern.permute.xlu0 %v1025_v3  ;;  %s951_s28 = scalar_lea.vmem %s1322_s11, 2048  ;;  %s1026_s29 = smov [#allocation5]  }
  0x3e   : > { %v280_v22 = vadd.f32 %v1211_v19, %v1209_v18  ;;  %v277_v23 = vadd.f32 %v1215_v21, %v1213_v20  ;;  %v374_v47 = vld [vmem:[%s1373_s3] sm:$0xff]  ;;  %v375_v57 = vld [vmem:[%s1373_s3 + $0x8] sm:$0xff]  ;;  %v376_v58 = vld [vmem:[%s1373_s3 + $0x10] sm:$0xff]  ;;  %p952_p6 = scmp.ne.s32.totalorder %s1322_s11, %s951_s28  ;;  %s955_s12 = sshll.u32 %s1026_s29, 4  ;;  %s956_s12 = int_to_ptr.vmem [resolvable:$false] %s955_s12 }
  0x3f   : > { %269 = vadd.xlane.f32.xlu1 %v268_v10  ;;  %805 = vmatprep.mubr.msk.f32.mxu1 %vm390_vm2, %v374_v47  ;;  %v292_v48 = vld [vmem:[%s1372_s2] sm:$0xf]  ;;  %v377_v59 = vld [vmem:[%s1373_s3 + $0x18] sm:$0xff]  ;;  %v379_v61 = vld [vmem:[%s1373_s3 + $0x28] sm:$0xff]  ;;  %s957_s14 = scalar_lea.vmem %s956_s12, 4096  ;;  %p958_p8 = scmp.lt.s32.totalorder %s1322_s11, %s956_s12 }
  0x40   : > { %263 = vadd.xlane.f32.xlu0 %v262_v11  ;;  %v378_v60 = vld [vmem:[%s1373_s3 + $0x20] sm:$0xff]  ;;  %v380_v62 = vld [vmem:[%s1373_s3 + $0x30] sm:$0xff]  ;;  %v381_v63 = vld [vmem:[%s1373_s3 + $0x38] sm:$0xff]  ;;  %p953_p12 = pnand %p952_p6, %p1382_p11  ;;  %p959_p10 = scmp.lt.s32.totalorder %s957_s14, %s951_s28 }
  0x41   : > { %v383_v7 = vld [vmem:[%s1374_s4 + $0x8] sm:$0xff]  ;;  %v382_v10 = vld [vmem:[%s1374_s4] sm:$0xff]  ;;  %v384_v25 = vld [vmem:[%s1374_s4 + $0x10] sm:$0xff] }
  0x42   : > { %p954_p13 = pneg %p953_p12  ;;  %p960_p0 = por %p959_p10, %p958_p8 }
  0x43   : > { %275 = vadd.xlane.f32.xlu1 %v274_v16 }
  0x44   : > { %272 = vadd.xlane.f32.xlu0 %v271_v17  ;;  %p961_p2 = pnand %p960_p0, %p954_p13 }
  0x47   : > { %281 = vadd.xlane.f32.xlu1 %v280_v22 }
  0x48   : > { %278 = vadd.xlane.f32.xlu0 %v277_v23  ;;  %v385_v23 = vld [vmem:[%s1374_s4 + $0x18] sm:$0xff] }
  0xc8   : > { %v267_v26 = vpop.xlane.xlu1 %266 }
  0xc9   : > { %v261_v27 = vpop.xlane.xlu0 %260  ;;  %v285_v32 = vmul.f32 0.00390625, %v267_v26 }
  0xca   : > { %v283_v30 = vmul.f32 0.00390625, %v261_v27 }
  0xcc   : > { %v270_v28 = vpop.xlane.xlu1 %269 }
  0xcd   : > { %v264_v29 = vpop.xlane.xlu0 %263  ;;  %v286_v33 = vmul.f32 0.00390625, %v270_v28 }
  0xce   : > { %v284_v31 = vmul.f32 0.00390625, %v264_v29 }
  0xcf   : > { %v821_v39 = vpack.c.bf16 %v286_v33, %v285_v32  ;;  %v386_v33 = vld [vmem:[%s1374_s4 + $0x20] sm:$0xff] }
  0xd0   : > { %v818_v34 = vpack.c.bf16 %v284_v31, %v283_v30  ;;  %v276_v35 = vpop.xlane.xlu1 %275  ;;  %v387_v31 = vld [vmem:[%s1374_s4 + $0x28] sm:$0xff] }
  0xd1   : > { %v273_v36 = vpop.xlane.xlu0 %272  ;;  %v288_v37 = vmul.f32 0.00390625, %v276_v35 }
  0xd2   : > { %819 = vmatpush3.bf16.msra.mxu0 %v818_v34  ;;  %v287_v38 = vmul.f32 0.00390625, %v273_v36 }
  0xd3   : > { %820 = vmatprep.subr.bf16.mxu0 %v1022_v24 }
  0xd4   : > { %v282_v40 = vpop.xlane.xlu1 %281  ;;  %v824_v42 = vpack.c.bf16 %v288_v37, %v287_v38 }
  0xd5   : > { %v279_v41 = vpop.xlane.xlu0 %278  ;;  %v290_v43 = vmul.f32 0.00390625, %v282_v40  ;;  %v388_v40 = vld [vmem:[%s1374_s4 + $0x30] sm:$0xff] }
  0xd6   : > { %822 = vmatpush3.bf16.msra.mxu0 %v821_v39  ;;  %v289_v44 = vmul.f32 0.00390625, %v279_v41 }
  0xd7   : > { %823 = vmatprep.subr.bf16.mxu0 %v1022_v24 }
  0xd8   : > { %v827_v45 = vpack.c.bf16 %v290_v43, %v289_v44  ;;  %v389_v44 = vld [vmem:[%s1374_s4 + $0x38] sm:$0xff] }
  0xda   : > { %825 = vmatpush3.bf16.msra.mxu0 %v824_v42 }
  0xdb   : > { %826 = vmatprep.subr.bf16.mxu0 %v1022_v24 }
  0xde   : > { %828 = vmatpush3.bf16.msra.mxu0 %v827_v45 }
  0xe1   : > { %801 = vmatmul.mubr.msk.f32.vlgmr.msra.gmra.mrb[0].mxu0 %vm293_vm1, %v291_v46 }
 0x1b4   : > { %v363_v49 = vpop.f32.mrb[0].mxu0 }
 0x1b5   : > { %v364_v50 = vadd.f32 %v363_v49, %v292_v48  ;;  %v802_v51 = vpop.f32.mrb[1].mxu0 }
 0x1b7   : > { %v741_v52 = vmul.f32 -1.442695, %v364_v50 }
 0x1b9   : > { %885 = vpow2.f32 %v741_v52 }
 0x1c3   : > { %v886_v53 = vpop.eup %885 }
 0x1c4   : > { %v370_v54 = vadd.f32 1.0, %v886_v53 }
 0x1c6   : > { %887 = vrcp.f32 %v370_v54 }
 0x1d0   : > { %v888_v55 = vpop.eup %887 }
 0x1d1   : > { %v373_v56 = vmul.f32 %v888_v55, %v364_v50 }
 0x1d3   : > { %803 = vmatprep.subr.msk.mxu1 %vm415_vm3, %v373_v56 }
 0x1d4   : > { %804 = vmatpush3.msk.msra.mxu1 %vm415_vm3, %v373_v56 }
 0x1d5   : > { %806 = vmatmul.mubr.msk.f32.vlgmr.msra.gmra.mrb[0].mxu1 %vm390_vm2, %v375_v57 }
 0x1d6   : > { %808 = vmatprep.mubr.msk.f32.mxu1 %vm390_vm2, %v376_v58 }
 0x1d9   : > { %809 = vmatmul.mubr.msk.f32.gmra.mrb[2].mxu1 %vm390_vm2, %v377_v59 }
 0x1da   : > { %811 = vmatprep.mubr.msk.f32.mxu1 %vm390_vm2, %v378_v60 }
 0x1dd   : > { %812 = vmatmul.mubr.msk.f32.gmra.mrb[4].mxu1 %vm390_vm2, %v379_v61 }
 0x1de   : > { %814 = vmatprep.mubr.msk.f32.mxu1 %vm390_vm2, %v380_v62 }
 0x1e1   : > { %815 = vmatmul.mubr.msk.f32.gmra.mrb[6].mxu1 %vm390_vm2, %v381_v63 }
 0x2a8   : > { %v807_v11 = vpop.f32.mrb[0].mxu1 }
 0x2a9   : > { %v491_v16 = vadd.f32 %v807_v11, %v383_v7  ;;  %v485_v17 = vpop.f32.mrb[1].mxu1 }
 0x2aa   : > { %v486_v22 = vadd.f32 %v485_v17, %v382_v10 }
 0x2ab   : > { %v752_v24 = vmul.f32 -1.442695, %v491_v16 }
 0x2ac   : > { %v751_v26 = vmul.f32 -1.442695, %v486_v22  ;;  %v810_v27 = vpop.f32.mrb[2].mxu1 }
 0x2ad   : > { %889 = vpow2.f32 %v752_v24  ;;  %v501_v28 = vadd.f32 %v810_v27, %v385_v23  ;;  %v495_v29 = vpop.f32.mrb[3].mxu1 }
 0x2ae   : > { %891 = vpow2.f32 %v751_v26  ;;  %v496_v30 = vadd.f32 %v495_v29, %v384_v25 }
 0x2af   : > { %v754_v32 = vmul.f32 -1.442695, %v501_v28 }
 0x2b0   : > { %v753_v34 = vmul.f32 -1.442695, %v496_v30  ;;  %v813_v35 = vpop.f32.mrb[4].mxu1 }
 0x2b1   : > { %893 = vpow2.f32 %v754_v32  ;;  %v511_v36 = vadd.f32 %v813_v35, %v387_v31  ;;  %v505_v37 = vpop.f32.mrb[5].mxu1 }
 0x2b2   : > { %895 = vpow2.f32 %v753_v34  ;;  %v506_v38 = vadd.f32 %v505_v37, %v386_v33 }
 0x2b3   : > { %v756_v39 = vmul.f32 -1.442695, %v511_v36 }
 0x2b4   : > { %v816_v41 = vpop.f32.mrb[6].mxu1  ;;  %v755_v42 = vmul.f32 -1.442695, %v506_v38 }
 0x2b5   : > { %897 = vpow2.f32 %v756_v39  ;;  %v515_v43 = vpop.f32.mrb[7].mxu1  ;;  %v521_v51 = vadd.f32 %v816_v41, %v389_v44 }
 0x2b6   : > { %v516_v45 = vadd.f32 %v515_v43, %v388_v40  ;;  %899 = vpow2.f32 %v755_v42 }
 0x2b7   : > { %v890_v46 = vpop.eup %889  ;;  %v758_v55 = vmul.f32 -1.442695, %v521_v51 }
 0x2b8   : > { %v892_v47 = vpop.eup %891  ;;  %v549_v48 = vadd.f32 1.0, %v890_v46  ;;  %v757_v49 = vmul.f32 -1.442695, %v516_v45 }
 0x2b9   : > { %v548_v50 = vadd.f32 1.0, %v892_v47 }
 0x2ba   : > { %901 = vrcp.f32 %v549_v48 }
 0x2bb   : > { %v894_v52 = vpop.eup %893  ;;  %903 = vrcp.f32 %v548_v50 }
 0x2bc   : > { %v896_v53 = vpop.eup %895  ;;  %v551_v54 = vadd.f32 1.0, %v894_v52  ;;  %905 = vpow2.f32 %v757_v49 }
 0x2bd   : > { %v550_v56 = vadd.f32 1.0, %v896_v53 }
 0x2be   : > { %907 = vrcp.f32 %v551_v54 }
 0x2bf   : > { %v898_v57 = vpop.eup %897  ;;  %909 = vpow2.f32 %v758_v55 }
 0x2c0   : > { %v553_v58 = vadd.f32 1.0, %v898_v57  ;;  %911 = vrcp.f32 %v550_v56  ;;  %v900_v59 = vpop.eup %899 }
 0x2c1   : > { %v552_v63 = vadd.f32 1.0, %v900_v59 }
 0x2c2   : > { %913 = vrcp.f32 %v553_v58 }
 0x2c3   : > { %915 = vrcp.f32 %v552_v63 }
 0x2c4   : > { %v902_v60 = vpop.eup %901 }
 0x2c5   : > { %v904_v61 = vpop.eup %903  ;;  %579 = vperm.xlu1 %884, %v902_v60  }
 0x2c6   : > { %v906_v62 = vpop.eup %905  ;;  %574 = vperm.xlu0 %883, %v904_v61  }
 0x2c7   : > { %v554_v7 = vadd.f32 1.0, %v906_v62 }
 0x2c8   : > { %v908_v3 = vpop.eup %907 }
 0x2c9   : > { %589 = vperm.xlu1 %884, %v908_v3   ;;  %v910_v10 = vpop.eup %909  ;;  %917 = vrcp.f32 %v554_v7 }
 0x2ca   : > { %v912_v11 = vpop.eup %911  ;;  %v555_v17 = vadd.f32 1.0, %v910_v10 }
 0x2cc   : > { %v914_v16 = vpop.eup %913  ;;  %919 = vrcp.f32 %v555_v17 }
 0x2cd   : > { %584 = vperm.xlu1 %884, %v912_v11   ;;  %v916_v22 = vpop.eup %915 }
 0x2d1   : > { %599 = vperm.xlu1 %884, %v914_v16  }
 0x2d3   : > { %v918_v23 = vpop.eup %917 }
 0x2d5   : > { %594 = vperm.xlu1 %884, %v916_v22  }
 0x2d6   : > { %v920_v24 = vpop.eup %919 }
 0x2d9   : > { %604 = vperm.xlu1 %884, %v918_v23  }
 0x2dd   : > { %609 = vperm.xlu1 %884, %v920_v24  }
 0x344   : > { %v580_v25 = vpop.permute.xlu1 %579 }
 0x345   : > { %v614_v26 = vmul.f32 %v580_v25, %v1189_v8  ;;  %v615_v27 = vmul.f32 %v580_v25, %v1191_v9  ;;  %v575_v28 = vpop.permute.xlu0 %574 }
 0x346   : > { %v612_v29 = vmul.f32 %v575_v28, %v1177_v2  ;;  %v613_v30 = vmul.f32 %v575_v28, %v1181_v4 }
 0x347   : > { %630 = vst [vmem:[%s1289_s10 + $0x10] sm:$0xff] %v614_v26  ;;  %631 = vst [vmem:[%s1289_s10 + $0x18] sm:$0xff] %v615_v27 }
 0x348   : > { %628 = vst [vmem:[%s1289_s10] sm:$0xff] %v612_v29  ;;  %629 = vst [vmem:[%s1289_s10 + $0x8] sm:$0xff] %v613_v30  ;;  %v590_v2 = vpop.permute.xlu1 %589 }
 0x349   : > { %v618_v4 = vmul.f32 %v590_v2, %v1183_v5  ;;  %v619_v8 = vmul.f32 %v590_v2, %v1185_v6 }
 0x34b   : > { %634 = vst [vmem:[%s1289_s10 + $0x30] sm:$0xff] %v618_v4  ;;  %635 = vst [vmem:[%s1289_s10 + $0x38] sm:$0xff] %v619_v8 }
 0x34c   : > { %v585_v9 = vpop.permute.xlu1 %584 }
 0x34d   : > { %v616_v31 = vmul.f32 %v585_v9, %v1173_v0  ;;  %v617_v32 = vmul.f32 %v585_v9, %v1175_v1 }
 0x34f   : > { %632 = vst [vmem:[%s1289_s10 + $0x20] sm:$0xff] %v616_v31  ;;  %633 = vst [vmem:[%s1289_s10 + $0x28] sm:$0xff] %v617_v32 }
 0x350   : > { %v600_v33 = vpop.permute.xlu1 %599 }
 0x351   : > { %v622_v5 = vmul.f32 %v600_v33, %v1197_v12  ;;  %v623_v6 = vmul.f32 %v600_v33, %v1199_v13 }
 0x353   : > { %638 = vst [vmem:[%s1289_s10 + $0x50] sm:$0xff] %v622_v5  ;;  %639 = vst [vmem:[%s1289_s10 + $0x58] sm:$0xff] %v623_v6 }
 0x354   : > { %v595_v34 = vpop.permute.xlu1 %594 }
 0x355   : > { %v620_v35 = vmul.f32 %v595_v34, %v1201_v14  ;;  %v621_v0 = vmul.f32 %v595_v34, %v1203_v15 }
 0x357   : > { %636 = vst [vmem:[%s1289_s10 + $0x40] sm:$0xff] %v620_v35  ;;  %637 = vst [vmem:[%s1289_s10 + $0x48] sm:$0xff] %v621_v0 }
 0x358   : > { %v605_v1 = vpop.permute.xlu1 %604 }
 0x359   : > { %v624_v36 = vmul.f32 %v605_v1, %v1213_v20  ;;  %v625_v12 = vmul.f32 %v605_v1, %v1215_v21 }
 0x35b   : > { %640 = vst [vmem:[%s1289_s10 + $0x60] sm:$0xff] %v624_v36  ;;  %641 = vst [vmem:[%s1289_s10 + $0x68] sm:$0xff] %v625_v12 }
 0x35c   : > { %v610_v13 = vpop.permute.xlu1 %609 }
 0x35d   : > { %v626_v14 = vmul.f32 %v610_v13, %v1209_v18  ;;  %v627_v15 = vmul.f32 %v610_v13, %v1211_v19 }
 0x35f   : > { %642 = vst [vmem:[%s1289_s10 + $0x70] sm:$0xff] %v626_v14  ;;  %643 = vst [vmem:[%s1289_s10 + $0x78] sm:$0xff] %v627_v15 }
 0x360   : > { %964 = shalt.err (!%p961_p2)
}
 0x361   : > { %s965_s15 = scalar_lea.hbm %s1320_s26, 2048  ;;  %s969_s7 = scalar_lea.hbm %s1375_s5, 4096 }
 0x362   : > { %p966_p4 = scmp.ne.s32.totalorder %s1320_s26, %s965_s15  ;;  %p970_p9 = scmp.lt.u32.totalorder %s1320_s26, %s1375_s5 }
 0x363   : > { %p971_p1 = scmp.lt.u32.totalorder %s969_s7, %s965_s15  ;;  %p973_p6 = scmp.lt.u32.totalorder %s965_s15, %s1320_s26 }
 0x364   : > { %p967_p5 = pnand %p966_p4, %p1382_p11 }
 0x365   : > { %p972_p3 = por %p971_p1, %p970_p9 }
 0x366   : > { %p968_p7 = pneg %p967_p5 }
 0x367   : > { %p974_p12 = por %p973_p6, %p972_p3 }
 0x369   : > { %p975_p13 = pnand %p974_p12, %p968_p7 }
 0x36b   : > { %978 = shalt.err (!%p975_p13)
}
 0x36c   : > { %s1027_s25 = smov 256   ;;  %s1028_s13 = smov 16  }
 0x36d   : > { %831 = dma.vmem_to_hbm [thread:$0]  (%p1382_p11), %s1322_s11, 2048, %s1320_s26, %s645_s22, %s1027_s25, %s1027_s25, %s1028_s13  }
 0x36e PF: > { %s673_s17 = sand.u32 1, %s1005_s18   ;;  %p1383_p8 = scmp.ne.s32.totalorder %s1380_s6, 0 }
 0x36f   : > { %p1384_p10 = scmp.ge.s32.totalorder %s1017_s21, 2  ;;  %s674_s28 = scalar_lea.sflag [#allocation4], %s673_s17 }
 0x371   : > { %p838_p0 = pnand %p1384_p10, %p1383_p8 }
 0x373   : > { %1000 = dma.done.wait (!%p838_p0), %s674_s28, 2048  }
 0x374   : > { %1002 = vsyncadd (!%p838_p0), %s674_s28, 4294965248  ;;  %p18_p2 = scmp.ge.s32.totalorder %s1084_s24, 4   ;;  %s1385_s18 = smov %s1009_s19 }
 0x375   : > { %s1386_s19 = smov %s1013_s20  ;;  %s1387_s20 = smov %s1096_s27 }
 0x376   : > { %s1388_s21 = smov %s1084_s24  ;;  %20 = sbr.rel (!%p18_p2) target bundleno = 5 (0x5), region = 85 }
 0x37d   :  { %679 = vsyncpa [#allocation3], 1 }
 0x37e   :  { %681 = vsyncpa [#allocation3 + $0x1], 1 }
 0x37f   :  { %682 = vsyncpa [#allocation4], 1 }
 0x380   :  { %684 = vsyncpa [#allocation4 + $0x1], 1 }

</bundles_post_ra>
